<compile_context>
chip_gen: v7x
topology: tpu7x:2x2x1
jax: 0.10.0
libtpu: 0.0.40
codegen_flags: <defaults>
</compile_context>

<pallas_src>
import functools

import jax
import jax.numpy as jnp
from jax.experimental import pallas as pl
from jax.experimental.pallas import tpu as pltpu

_LANE = 128
_MAX_TILE_B = 1024   # >= 512-row efficiency knee; tiny VMEM cost in (C,B) layout


def _gce_kernel(logits_ref, targets_ref, loss_ref, *, q, smoothing,
                inv_temperature, num_classes):
    """One (C, TILE_B) block -> per-sample GCE loss as a (1, TILE_B) row."""
    z = logits_ref[...].astype(jnp.float32) * inv_temperature      # (C, Bt)
    tgt = targets_ref[...]                                          # (1, Bt) int32

    # Numerically stable softmax pieces along the class (sublane) axis.
    z = z - jnp.max(z, axis=0, keepdims=True)
    e = jnp.exp(z)                                                  # (C, Bt)
    sum_e = jnp.sum(e, axis=0, keepdims=True)                       # (1, Bt)

    # exp(z) at the target class: sublane iota vs. the (1, Bt) target row.
    cls = jax.lax.broadcasted_iota(jnp.int32, e.shape, 0)           # (C, Bt)
    e_t = jnp.sum(jnp.where(cls == tgt, e, 0.0), axis=0, keepdims=True)

    # pt = (1 - s) * p_target + s / C        (uses sum_j probs_j == 1)
    inv_sum = pl.reciprocal(sum_e, approx=True)                     # EUP slot
    pt = (1.0 - smoothing) * e_t * inv_sum + (smoothing / num_classes)

    # loss = (1 - pt**q) / q.  pt >= smoothing/num_classes, so no clamp is
    # needed; pow is lowered as exp(q * log(pt)) (EUP path).
    pt_q = jnp.exp(q * jnp.log(pt))
    loss = (1.0 - pt_q) * (1.0 / q)

    # Zero out padded samples (their targets were padded with -1).
    loss_ref[...] = jnp.where(tgt >= 0, loss, 0.0)


def gce_loss(logits, targets, *, q=0.7, smoothing=0.1, temperature=2.0,
             num_classes=6, reduction="mean"):
    """logits: (B, C) float (f32 or bf16), targets: (B,) int.

    reduction: 'mean' | 'sum' | 'none'  (matches the PyTorch module).
    """
    b, c = logits.shape
    assert c == num_classes
    assert 0.0 < q <= 1.0, "q should be in (0, 1]"

    # Batch tile: a multiple of 128 lanes (lane-dense, unmasked output stores),
    # capped at _MAX_TILE_B.  Pad the batch to a tile multiple; padded columns
    # carry target=-1 and are masked to zero loss inside the kernel.
    tile_b = min(_MAX_TILE_B, _LANE * ((b + _LANE - 1) // _LANE))
    b_pad = tile_b * ((b + tile_b - 1) // tile_b)
    nb = b_pad // tile_b

    logits_cb = jnp.transpose(logits)                         # (C, B): batch on lanes
    targets_row = targets.reshape(1, b).astype(jnp.int32)     # (1, B)
    if b_pad != b:
        logits_cb = jnp.pad(logits_cb, ((0, 0), (0, b_pad - b)))
        targets_row = jnp.pad(targets_row, ((0, 0), (0, b_pad - b)),
                              constant_values=-1)

    kernel = functools.partial(
        _gce_kernel, q=float(q), smoothing=float(smoothing),
        inv_temperature=1.0 / float(temperature), num_classes=num_classes)

    per_sample = pl.pallas_call(
        kernel,
        out_shape=jax.ShapeDtypeStruct((1, b_pad), jnp.float32),
        grid=(nb,),
        in_specs=[
            pl.BlockSpec((c, tile_b), lambda i: (0, i)),       # logits (C, TILE_B)
            pl.BlockSpec((1, tile_b), lambda i: (0, i)),       # targets (1, TILE_B)
        ],
        out_specs=pl.BlockSpec((1, tile_b), lambda i: (0, i)),  # lane-dense losses
        compiler_params=pltpu.CompilerParams(
            dimension_semantics=("parallel",)),                 # megacore-splittable
    )(logits_cb, targets_row)

    per_sample = per_sample[0, :b]
    if reduction == "mean":
        return jnp.sum(per_sample) / b
    elif reduction == "sum":
        return jnp.sum(per_sample)
    elif reduction == "none":
        return per_sample
    else:
        raise ValueError("reduction must be 'mean', 'sum' or 'none'")


def _reference(logits, targets, *, q=0.7, smoothing=0.1, temperature=2.0,
               num_classes=6, reduction="mean"):
    # Pure-JAX mirror of the PyTorch forward.
    probs = jax.nn.softmax(logits / temperature, axis=1)
    one_hot = jax.nn.one_hot(targets, num_classes, dtype=jnp.float32)
    t = (1.0 - smoothing) * one_hot + smoothing / num_classes
    pt = jnp.sum(probs * t, axis=1)
    loss = (1.0 - pt ** q) / q
    if reduction == "mean":
        return jnp.mean(loss)
    if reduction == "sum":
        return jnp.sum(loss)
    return loss


if __name__ == "__main__":
    key = jax.random.PRNGKey(0)
    k1, k2 = jax.random.split(key, 2)

    B, C = 8, 6  # batch of 8, 6 classes (module default num_classes=6)
    logits = jax.random.normal(k1, (B, C), dtype=jnp.float32)
    targets = jax.random.randint(k2, (B,), 0, C, dtype=jnp.int32)

    # Tolerance covers the approximate EUP reciprocal (pl.reciprocal
    # approx=True) and exp(q*log(pt)) vs pt**q rounding -- pure f32/EUP
    # rounding effects, not masked bugs (per the review).
    TOL = dict(atol=2e-3, rtol=2e-3)

    loss = jax.block_until_ready(
        gce_loss(logits, targets, q=0.7, smoothing=0.1, temperature=2.0,
                 num_classes=C, reduction="mean"))
    ref = _reference(logits, targets, q=0.7, smoothing=0.1, temperature=2.0,
                     num_classes=C, reduction="mean")
    assert jnp.allclose(loss, ref, **TOL), (loss, ref)

    per = jax.block_until_ready(
        gce_loss(logits, targets, q=0.7, smoothing=0.1, temperature=2.0,
                 num_classes=C, reduction="none"))
    per_ref = _reference(logits, targets, q=0.7, smoothing=0.1,
                         temperature=2.0, num_classes=C, reduction="none")
    assert per.shape == (B,)
    assert jnp.allclose(per, per_ref, **TOL), (per, per_ref)

    print("KERNEL_OK")
</pallas_src>

<mosaic_0001>
module attributes {stable_mosaic.version = 11 : i64} {
  func.func @_gce_kernel(%arg0: i32, %arg1: memref<6x128xf32, #tpu.memory_space<vmem>>, %arg2: memref<1x128xi32, #tpu.memory_space<vmem>>, %arg3: memref<1x128xf32, #tpu.memory_space<vmem>>) attributes {dimension_semantics = [#tpu.dimension_semantics<parallel>], iteration_bounds = array<i64: 1>, scalar_prefetch = 0 : i64, scratch_operands = 0 : i64, tpu.core_type = #tpu.core_type<tc>, window_params = [{transform_indices = @transform_0, window_bounds = array<i64: 6, 128>}, {transform_indices = @transform_1, window_bounds = array<i64: 1, 128>}, {transform_indices = @transform_2, window_bounds = array<i64: 1, 128>}]} {
    %c0 = arith.constant 0 : index
    %c0_0 = arith.constant 0 : index
    %0 = vector.load %arg1[%c0, %c0_0] : memref<6x128xf32, #tpu.memory_space<vmem>>, vector<6x128xf32>
    %cst = arith.constant 5.000000e-01 : f32
    %1 = vector.broadcast %cst : f32 to vector<6x128xf32>
    %2 = arith.mulf %0, %1 : vector<6x128xf32>
    %c0_1 = arith.constant 0 : index
    %c0_2 = arith.constant 0 : index
    %3 = vector.load %arg2[%c0_1, %c0_2] : memref<1x128xi32, #tpu.memory_space<vmem>>, vector<1x128xi32>
    %cst_3 = arith.constant dense<0xFF800000> : vector<128xf32>
    %4 = vector.multi_reduction <maximumf>, %2, %cst_3 [0] : vector<6x128xf32> to vector<128xf32>
    %5 = vector.shape_cast %4 : vector<128xf32> to vector<1x128xf32>
    %6 = vector.broadcast %5 : vector<1x128xf32> to vector<6x128xf32>
    %7 = arith.subf %2, %6 : vector<6x128xf32>
    %8 = math.exp %7 : vector<6x128xf32>
    %cst_4 = arith.constant dense<0.000000e+00> : vector<128xf32>
    %9 = vector.multi_reduction <add>, %8, %cst_4 [0] : vector<6x128xf32> to vector<128xf32>
    %10 = vector.shape_cast %9 : vector<128xf32> to vector<1x128xf32>
    %11 = tpu.iota {dimensions = array<i32: 0>} : vector<6x128xi32>
    %12 = vector.broadcast %3 : vector<1x128xi32> to vector<6x128xi32>
    %13 = arith.cmpi eq, %11, %12 : vector<6x128xi32>
    %cst_5 = arith.constant 0.000000e+00 : f32
    %14 = vector.broadcast %cst_5 : f32 to vector<6x128xf32>
    %15 = arith.select %13, %8, %14 : vector<6x128xi1>, vector<6x128xf32>
    %cst_6 = arith.constant dense<0.000000e+00> : vector<128xf32>
    %16 = vector.multi_reduction <add>, %15, %cst_6 [0] : vector<6x128xf32> to vector<128xf32>
    %17 = vector.shape_cast %16 : vector<128xf32> to vector<1x128xf32>
    %18 = tpu.reciprocal %10 {approx = true} : vector<1x128xf32> -> vector<1x128xf32>
    %cst_7 = arith.constant 0.899999976 : f32
    %19 = vector.broadcast %cst_7 : f32 to vector<1x128xf32>
    %20 = arith.mulf %19, %17 : vector<1x128xf32>
    %21 = arith.mulf %20, %18 : vector<1x128xf32>
    %cst_8 = arith.constant 0.0166666675 : f32
    %22 = vector.broadcast %cst_8 : f32 to vector<1x128xf32>
    %23 = arith.addf %21, %22 : vector<1x128xf32>
    %24 = math.log %23 : vector<1x128xf32>
    %cst_9 = arith.constant 0.699999988 : f32
    %25 = vector.broadcast %cst_9 : f32 to vector<1x128xf32>
    %26 = arith.mulf %25, %24 : vector<1x128xf32>
    %27 = math.exp %26 : vector<1x128xf32>
    %cst_10 = arith.constant 1.000000e+00 : f32
    %28 = vector.broadcast %cst_10 : f32 to vector<1x128xf32>
    %29 = arith.subf %28, %27 : vector<1x128xf32>
    %cst_11 = arith.constant 1.42857146 : f32
    %30 = vector.broadcast %cst_11 : f32 to vector<1x128xf32>
    %31 = arith.mulf %29, %30 : vector<1x128xf32>
    %c0_i32 = arith.constant 0 : i32
    %32 = vector.broadcast %c0_i32 : i32 to vector<1x128xi32>
    %33 = arith.cmpi sge, %3, %32 : vector<1x128xi32>
    %cst_12 = arith.constant 0.000000e+00 : f32
    %34 = vector.broadcast %cst_12 : f32 to vector<1x128xf32>
    %35 = arith.select %33, %31, %34 : vector<1x128xi1>, vector<1x128xf32>
    %c0_13 = arith.constant 0 : index
    %c0_14 = arith.constant 0 : index
    %36 = vector.load %arg3[%c0_13, %c0_14] : memref<1x128xf32, #tpu.memory_space<vmem>>, vector<1x128xf32>
    tpu.vector_store %arg3[%c0_13, %c0_14], %35 {strides = array<i32>} : memref<1x128xf32, #tpu.memory_space<vmem>>, vector<1x128xf32>,
    return
  }
  func.func @transform_0(%arg0: i32) -> (i32, i32) {
    %c0_i32 = arith.constant 0 : i32
    %c0_i32_0 = arith.constant 0 : i32
    return %c0_i32, %arg0 : i32, i32
  }
  func.func @transform_1(%arg0: i32) -> (i32, i32) {
    %c0_i32 = arith.constant 0 : i32
    %c0_i32_0 = arith.constant 0 : i32
    return %c0_i32, %arg0 : i32, i32
  }
  func.func @transform_2(%arg0: i32) -> (i32, i32) {
    %c0_i32 = arith.constant 0 : i32
    %c0_i32_0 = arith.constant 0 : i32
    return %c0_i32, %arg0 : i32, i32
  }
}

</mosaic_0001>

<bundles_post_ra>
// kernel: tpu_custom_call.1
= control target key start
LH: loop header
LB: loop body
LE: loop exit
PB: predicated region body
PF: predicated region fallthrough
CT: control target
= control target key end

     0   :  { %7 = vsyncpa [#allocation3], 0  ;;  %s194_s0 = inlined_call_operand.hbm [shape: f32[6,128], index: 0, kind: input, shape index: {}]   ;;  %s195_s1 = inlined_call_operand.vmem [shape: s32[1,128], index: 1, kind: input, shape index: {}]   ;;  %s196_s2 = inlined_call_operand.hbm [shape: f32[1,128], index: 2, kind: output, shape index: {}]  }
   0x1   :  { %8 = vsyncpa [#allocation4], 0  ;;  %s147_s9 = smov [#allocation2]   ;;  %s99_s13 = scalar_lea.hbm %s194_s0, 128 }
   0x2   :  { %s15_s10 = sshll.u32 %s147_s9, 4  ;;  %p100_p0 = scmp.ne.s32.totalorder %s194_s0, %s99_s13  ;;  %s16_s10 = int_to_ptr.vmem [resolvable:$true] %s15_s10 }
   0x3   :  { %p103_p1 = scmp.lt.u32.totalorder %s99_s13, %s194_s0 }
   0x5   :  { %p105_p2 = pnand %p103_p1, %p100_p0 }
   0x7   :  { %108 = shalt.err (!%p105_p2)
}
   0x8   :  { %s109_s18 = scalar_lea.vmem %s16_s10, 128  ;;  %p114_p4 = scmp.lt.s32.totalorder %s16_s10, %s16_s10 }
   0x9   :  { %p110_p3 = scmp.ne.s32.totalorder %s16_s10, %s109_s18  ;;  %p115_p5 = scmp.lt.s32.totalorder %s109_s18, %s109_s18 }
   0xb   :  { %p116_p6 = por %p115_p5, %p114_p4 }
   0xd   :  { %p117_p7 = pnand %p116_p6, %p110_p3 }
   0xf   :  { %120 = shalt.err (!%p117_p7)
}
  0x10   :  { %18 = dma.hbm_to_vmem [thread:$0]  %s194_s0, 128, %s16_s10, [#allocation3]  }
  0x11   :  { %143 = dma.done.wait [#allocation3], 128  }
  0x12   :  { %144 = vsyncadd [#allocation3], 4294967168  ;;  %v24_v0 = vld [vmem:[#allocation2] sm:$0x3f]  ;;  %vm27_vm0 = vcmask 1045504   ;;  %v45_v8 = vlaneseq }
  0x13   :  { %v25_v1 = vmul.f32 0.5, %v24_v0  ;;  %v26_v14 = vld [vmem:[%s195_s1] sm:$0x1]  ;;  %s148_s1 = smov [#allocation5]  }
  0x14   :  { %v46_v11 = vshrl.u32 %v45_v8, 7  ;;  %s80_s22 = sshll.u32 %s148_s1, 4  ;;  %vm71_vm2 = vcmp.ge.s32.totalorder %v26_v14, 0  ;;  %s81_s22 = int_to_ptr.vmem [resolvable:$true] %s80_s22 }
  0x15   :  { %v28_v2 = vsel %vm27_vm0, %v25_v1, -inf  ;;  %s121_s23 = scalar_lea.vmem %s81_s22, 16  ;;  %s125_s24 = scalar_lea.vmem %s81_s22, 32 }
  0x16   :  { %v29_v3 = vrot.slane %v28_v2, 4  ;;  %v49_v13 = vsub.s32 0, %v46_v11  ;;  %p122_p8 = scmp.ne.s32.totalorder %s81_s22, %s121_s23  ;;  %p126_p9 = scmp.lt.s32.totalorder %s81_s22, %s81_s22 }
  0x17   :  { %p127_p10 = scmp.lt.s32.totalorder %s125_s24, %s121_s23 }
  0x18   :  { %v30_v4 = vmax.f32 %v28_v2, %v29_v3  ;;  %v50_v15 = vrot.slane %v26_v14, %v49_v13 }
  0x19   :  { %p128_p11 = por %p127_p10, %p126_p9 }
  0x1a   :  { %v31_v5 = vrot.slane %v30_v4, 2  ;;  %vm51_vm1 = vcmp.eq.s32.totalorder %v46_v11, %v50_v15 }
  0x1b   :  { %p129_p12 = pnand %p128_p11, %p122_p8 }
  0x1c   :  { %v32_v6 = vmax.f32 %v30_v4, %v31_v5 }
  0x1e   :  { %v33_v7 = vrot.slane %v32_v6, 1 }
  0x20   :  { %v34_v9 = vmax.f32 %v32_v6, %v33_v7 }
  0x22   :  { %v35_v10 = vsub.f32 %v25_v1, %v34_v9 }
  0x24   :  { %v36_v12 = vmul.f32 1.442695, %v35_v10 }
  0x26   :  { %91 = vpow2.f32 %v36_v12 }
  0x30   :  { %v92_v16 = vpop.eup %91 }
  0x31   :  { %v38_v17 = vsel %vm27_vm0, %v92_v16, 0.0  ;;  %v52_v18 = vsel %vm51_vm1, %v92_v16, 0.0 }
  0x32   :  { %v39_v19 = vrot.slane %v38_v17, 4  ;;  %v53_v20 = vsel %vm27_vm0, %v52_v18, 0.0 }
  0x33   :  { %v54_v21 = vrot.slane %v53_v20, 4 }
  0x34   :  { %v40_v22 = vadd.f32 %v39_v19, %v38_v17 }
  0x35   :  { %v55_v23 = vadd.f32 %v54_v21, %v53_v20 }
  0x36   :  { %v41_v24 = vrot.slane %v40_v22, 2 }
  0x37   :  { %v56_v25 = vrot.slane %v55_v23, 2 }
  0x38   :  { %v42_v26 = vadd.f32 %v41_v24, %v40_v22 }
  0x39   :  { %v57_v27 = vadd.f32 %v56_v25, %v55_v23 }
  0x3a   :  { %v43_v28 = vrot.slane %v42_v26, 1 }
  0x3b   :  { %v58_v30 = vrot.slane %v57_v27, 1 }
  0x3c   :  { %v44_v29 = vadd.f32 %v43_v28, %v42_v26 }
  0x3d   :  { %v59_v31 = vadd.f32 %v58_v30, %v57_v27 }
  0x3e   :  { %93 = vrcp.f32 %v44_v29 }
  0x3f   :  { %v61_v32 = vmul.f32 0.9, %v59_v31 }
  0x48   :  { %v94_v33 = vpop.eup %93 }
  0x49   :  { %v62_v34 = vmul.f32 %v94_v33, %v61_v32 }
  0x4b   :  { %v63_v35 = vadd.f32 0.016666668, %v62_v34 }
  0x4d   :  { %95 = vlog2.f32 %v63_v35 }
  0x57   :  { %v96_v36 = vpop.eup %95 }
  0x58   :  { %v65_v37 = vmul.f32 0.6931472, %v96_v36 }
  0x5a   :  { %v66_v38 = vmul.f32 0.7, %v65_v37 }
  0x5c   :  { %v67_v39 = vmul.f32 1.442695, %v66_v38 }
  0x5e   :  { %97 = vpow2.f32 %v67_v39 }
  0x68   :  { %v98_v40 = vpop.eup %97 }
  0x69   :  { %v69_v41 = vsub.f32 1.0, %v98_v40 }
  0x6b   :  { %v70_v42 = vmul.f32 1.4285715, %v69_v41 }
  0x6d   :  { %v72_v43 = vsel %vm71_vm2, %v70_v42, 0.0 }
  0x6e   :  { %73 = vst [vmem:[#allocation5] sm:$0x1] %v72_v43 }
  0x6f   :  { %132 = shalt.err (!%p129_p12)
}
  0x70   :  { %s133_s27 = scalar_lea.hbm %s196_s2, 16 }
  0x71   :  { %p134_p13 = scmp.ne.s32.totalorder %s196_s2, %s133_s27  ;;  %p137_p0 = scmp.lt.u32.totalorder %s133_s27, %s196_s2 }
  0x73   :  { %p139_p1 = pnand %p137_p0, %p134_p13 }
  0x75   :  { %142 = shalt.err (!%p139_p1)
}
  0x76   :  { %83 = dma.vmem_to_hbm [thread:$0]  %s81_s22, 16, %s196_s2, [#allocation4]  }
  0x77   :  { %145 = dma.done.wait [#allocation4], 16  }
  0x78   :  { %146 = vsyncadd [#allocation4], 4294967280 }
  0x79   :  { %87 = vsyncpa [#allocation3], 1 }
  0x7a   :  { %88 = vsyncpa [#allocation4], 1 }

</bundles_post_ra>
